<compile_context>
chip_gen: v7x
topology: tpu7x:2x2x1
jax: 0.10.0
libtpu: 0.0.40
codegen_flags: <defaults>
</compile_context>

<pallas_src>
import numpy as np
import jax
import jax.numpy as jnp
from jax.experimental import pallas as pl
from jax.experimental.pallas import tpu as pltpu


_CHUNK_ROWS = 16          # in-kernel compute chunk: (16, 128) sublanes x lanes


def _round_up(a, m):
    return ((a + m - 1) // m) * m


# ---------------------------------------------------------------------------
# Bilinear interpolation matrices (PyTorch nn.Upsample, align_corners=False)
# ---------------------------------------------------------------------------
def _bilinear_matrix_1d(out_size, in_size):
    if in_size == out_size:
        return np.eye(out_size, dtype=np.float32)
    scale = in_size / out_size
    i = np.arange(out_size, dtype=np.float64)
    src = (i + 0.5) * scale - 0.5
    src = np.maximum(src, 0.0)                      # PyTorch clamps negative coords
    i0 = np.minimum(np.floor(src).astype(np.int64), in_size - 1)
    i1 = np.minimum(i0 + 1, in_size - 1)
    w1 = src - i0
    w0 = 1.0 - w1
    M = np.zeros((out_size, in_size), dtype=np.float32)
    M[np.arange(out_size), i0] += w0
    M[np.arange(out_size), i1] += w1
    return M


# ---------------------------------------------------------------------------
# Generation-gated tiling / VMEM budget
# ---------------------------------------------------------------------------
def _tpu_tile_budget():
    """Returns (max tile rows, scoped-VMEM cap bytes) for the local TPU gen."""
    kind = ""
    try:
        kind = jax.devices()[0].device_kind.lower()
    except Exception:
        pass
    if ("v5" in kind) or ("v6" in kind):
        return 1024, 64 << 20          # 128 MiB physical VMEM -> big tiles OK
    return 512, 32 << 20               # v7x (64 MiB physical) / unknown: conservative


# ---------------------------------------------------------------------------
# Pallas kernel: one (batch, spatial-tile) grid point per invocation.
# Blocks are (1, C, R, 128); the kernel walks the block in (16,128) chunks.
# All channel contractions run on the VPU (channel counts are tiny).
# ---------------------------------------------------------------------------
def _grid_attn_kernel(x_ref, phi_ref, theta_w_ref, psi_w_ref, psi_b_ref,
                      y_ref, att_ref):
    cin = x_ref.shape[1]
    cint = phi_ref.shape[1]
    rows = x_ref.shape[2]
    n_chunks = rows // _CHUNK_ROWS

    # Scalar parameters live in SMEM; hoist the reads out of the chunk loop.
    th = [[theta_w_ref[i, c] for c in range(cint)] for i in range(cin)]
    pw = [psi_w_ref[c] for c in range(cint)]
    pb = psi_b_ref[0]

    @pl.loop(0, n_chunks)
    def _(s):
        r0 = pl.multiple_of(s * _CHUNK_ROWS, _CHUNK_ROWS)
        sl = pl.ds(r0, _CHUNK_ROWS)

        # register-resident (16,128) chunks; all arithmetic stays in f32
        xc = [x_ref[0, i, sl, :].astype(jnp.float32) for i in range(cin)]

        psi = None
        for c in range(cint):
            f_c = phi_ref[0, c, sl, :].astype(jnp.float32)
            for i in range(cin):
                f_c = f_c + th[i][c] * xc[i]        # theta 1x1 conv + phi add
            f_c = jnp.maximum(f_c, 0.0)             # ReLU
            term = pw[c] * f_c                      # psi 1x1 conv (N=1)
            psi = term if psi is None else psi + term

        att = jax.nn.sigmoid(psi + pb)              # (16, 128) f32

        att_ref[0, 0, sl, :] = att.astype(att_ref.dtype)
        for i in range(cin):
            y_ref[0, i, sl, :] = (att * xc[i]).astype(y_ref.dtype)


# ---------------------------------------------------------------------------
# Wrapper (NCHW in / NCHW out, like the PyTorch module)
# ---------------------------------------------------------------------------
def grid_attention_block_2d(x, g, theta_w, phi_w, psi_w, psi_b, input_size,
                            max_rows=None):
    B, Cin, H, W = x.shape
    Bg, Cg, Hg, Wg = g.shape
    assert B == Bg
    Ho, Wo = input_size
    assert (Ho, Wo) == (H, W), (
        "input_size must equal x's spatial size (second upsample is identity)")
    HW = H * W
    Cint = theta_w.shape[1]
    assert theta_w.shape == (Cin, Cint)
    assert phi_w.shape == (Cg, Cint)

    out_dtype = x.dtype        # keep the caller's dtype for y (bf16-friendly)

    # --- tiny gating path (1x1 conv on g + separable bilinear upsample) ------
    # Done in plain JAX: O(Cint*Hg*Wg) work; no dense Kron(R, C) matrix.
    # TODO(synk): move this separable upsample in-kernel to save the
    # (B,Cint,HW) HBM round trip (see module docstring).
    R_mat = jnp.asarray(_bilinear_matrix_1d(H, Hg))            # (H, Hg)
    C_mat = jnp.asarray(_bilinear_matrix_1d(W, Wg))            # (W, Wg)
    phi_g = jnp.einsum('bgpq,gd->bdpq', g.astype(jnp.float32),
                       phi_w.astype(jnp.float32))
    phi_up = jnp.einsum('hp,bdpq,wq->bdhw', R_mat, phi_g, C_mat)  # (B,Cint,H,W)

    x_flat = x.reshape(B, Cin, HW)
    phi_flat = phi_up.reshape(B, Cint, HW).astype(out_dtype)

    # --- tile selection (sublane-dense rows of 128 lanes) ---------------------
    gen_max_rows, vmem_cap = _tpu_tile_budget()
    if max_rows is not None:
        gen_max_rows = max(int(max_rows), _CHUNK_ROWS)

    rows_total = _round_up(pl.cdiv(HW, 128), _CHUNK_ROWS)
    desired_tiles = max(1, -(-16 // B))                     # aim >=16 grid steps
    rows_parallel = _round_up(-(-rows_total // desired_tiles), _CHUNK_ROWS)

    R = min(gen_max_rows, rows_total)
    # Shrink for megacore/pipeline parallelism, but never below 256 rows
    # (keeps per-step HBM traffic ~1.4 MB so the ~0.35us step cost stays small).
    R = max(min(R, max(rows_parallel, 256)), _CHUNK_ROWS)
    R = _round_up(R, _CHUNK_ROWS)

    HWp = _round_up(HW, R * 128)
    n_tiles = HWp // (R * 128)
    n_rows = HWp // 128
    assert n_rows % R == 0 and R % _CHUNK_ROWS == 0

    if HWp != HW:
        pad = HWp - HW
        x_flat = jnp.pad(x_flat, ((0, 0), (0, 0), (0, pad)))
        phi_flat = jnp.pad(phi_flat, ((0, 0), (0, 0), (0, pad)))

    x_blk = x_flat.reshape(B, Cin, n_rows, 128)
    phi_blk = phi_flat.reshape(B, Cint, n_rows, 128)

    # scalar parameters -> SMEM
    theta_w_s = theta_w.astype(jnp.float32)                  # (Cin, Cint)
    psi_w_s = jnp.reshape(psi_w, (Cint,)).astype(jnp.float32)
    psi_b_s = jnp.reshape(psi_b, (1,)).astype(jnp.float32)

    # Padded-block VMEM estimate: double-buffered in/out blocks + slack,
    # clamped to a generation-aware cap.
    itemsize = jnp.dtype(out_dtype).itemsize
    block_bytes = R * 128 * (itemsize * (2 * Cin + Cint) + 4)   # x,y,phi + f32 att
    vmem_limit = int(min(max(2 * block_bytes + (4 << 20), 16 << 20), vmem_cap))

    y_blk, att_blk = pl.pallas_call(
        _grid_attn_kernel,
        out_shape=(jax.ShapeDtypeStruct((B, Cin, n_rows, 128), out_dtype),
                   jax.ShapeDtypeStruct((B, 1, n_rows, 128), jnp.float32)),
        grid_spec=pltpu.PrefetchScalarGridSpec(
            num_scalar_prefetch=0,
            grid=(B, n_tiles),
            in_specs=[
                pl.BlockSpec((1, Cin, R, 128), lambda b, t: (b, 0, t, 0)),   # x
                pl.BlockSpec((1, Cint, R, 128), lambda b, t: (b, 0, t, 0)),  # phi
                pl.BlockSpec(memory_space=pltpu.MemorySpace.SMEM),           # theta_w
                pl.BlockSpec(memory_space=pltpu.MemorySpace.SMEM),           # psi_w
                pl.BlockSpec(memory_space=pltpu.MemorySpace.SMEM),           # psi_b
            ],
            out_specs=[
                pl.BlockSpec((1, Cin, R, 128), lambda b, t: (b, 0, t, 0)),   # y
                pl.BlockSpec((1, 1, R, 128), lambda b, t: (b, 0, t, 0)),     # att
            ],
        ),
        compiler_params=pltpu.CompilerParams(
            dimension_semantics=("parallel", "parallel"),
            vmem_limit_bytes=vmem_limit),
    )(x_blk, phi_blk, theta_w_s, psi_w_s, psi_b_s)

    W_y = y_blk.reshape(B, Cin, HWp)[:, :, :HW].reshape(B, Cin, H, W)
    sigm_psi_f = att_blk.reshape(B, 1, HWp)[:, :, :HW].reshape(B, 1, H, W)
    return W_y, sigm_psi_f


# ---------------------------------------------------------------------------
# Pure-JAX reference (same math) for a correctness check
# ---------------------------------------------------------------------------
def _reference(x, g, theta_w, phi_w, psi_w, psi_b, input_size):
    _, _, H, W = x.shape
    _, _, Hg, Wg = g.shape
    theta_x = jnp.einsum('bchw,cd->bdhw', x, theta_w)
    phi_g = jnp.einsum('bchw,cd->bdhw', g, phi_w)
    R = jnp.asarray(_bilinear_matrix_1d(H, Hg))
    C = jnp.asarray(_bilinear_matrix_1d(W, Wg))
    phi_up = jnp.einsum('hp,bdpq,wq->bdhw', R, phi_g, C)
    f = jax.nn.relu(theta_x + phi_up)
    psi_f = jnp.einsum('bdhw,d->bhw', f, psi_w[:, 0])[:, None] + psi_b
    att = jax.nn.sigmoid(psi_f)
    return att * x, att


def _run_case(key, B, Cin, H, W, Cg, Hg, Wg, max_rows=None):
    k1, k2, k3, k4, k5 = jax.random.split(key, 5)
    Cint = max(Cin // 2, 1)
    x = jax.random.normal(k1, (B, Cin, H, W), dtype=jnp.float32)
    g = jax.random.normal(k2, (B, Cg, Hg, Wg), dtype=jnp.float32)
    theta_w = jax.random.normal(k3, (Cin, Cint), dtype=jnp.float32) * np.sqrt(2.0 / Cin)
    phi_w = jax.random.normal(k4, (Cg, Cint), dtype=jnp.float32) * np.sqrt(2.0 / Cg)
    psi_w = jax.random.normal(k5, (Cint, 1), dtype=jnp.float32) * np.sqrt(2.0 / Cint)
    psi_b = jnp.float32(10.0)   # nn.init.constant_(self.psi.bias, 10.0)

    W_y, sigm_psi_f = grid_attention_block_2d(
        x, g, theta_w, phi_w, psi_w, psi_b, input_size=(H, W), max_rows=max_rows)
    jax.block_until_ready((W_y, sigm_psi_f))

    y_ref, att_ref = _reference(x, g, theta_w, phi_w, psi_w, psi_b, (H, W))
    assert W_y.shape == (B, Cin, H, W) and sigm_psi_f.shape == (B, 1, H, W)
    np.testing.assert_allclose(np.asarray(W_y), np.asarray(y_ref),
                               rtol=1e-5, atol=1e-5)
    np.testing.assert_allclose(np.asarray(sigm_psi_f), np.asarray(att_ref),
                               rtol=1e-5, atol=1e-5)


if __name__ == "__main__":
    key = jax.random.PRNGKey(0)
    k_a, k_b = jax.random.split(key, 2)

    # Case 1: module-sized config (in_channels=4 -> inter_channels=2,
    # gating 4x4x4 upsampled to 16x16).  HW=256 pads to one 16-row tile.
    _run_case(k_a, B=2, Cin=4, H=16, W=16, Cg=4, Hg=4, Wg=4)

    # Case 2: non-128-multiple HW (48x48 -> 2304) with max_rows=16 so the
    # multi-tile path and zero-padding/slicing are exercised (grid (2,2)).
    _run_case(k_b, B=2, Cin=4, H=48, W=48, Cg=4, Hg=12, Wg=12, max_rows=16)

    print("KERNEL_OK")
</pallas_src>

<mosaic_0001>
module attributes {stable_mosaic.version = 11 : i64} {
  func.func @_grid_attn_kernel(%arg0: i32, %arg1: i32, %arg2: memref<1x4x16x128xf32, #tpu.memory_space<vmem>>, %arg3: memref<1x2x16x128xf32, #tpu.memory_space<vmem>>, %arg4: memref<4x2xf32, #tpu.memory_space<smem>>, %arg5: memref<2xf32, #tpu.memory_space<smem>>, %arg6: memref<1xf32, #tpu.memory_space<smem>>, %arg7: memref<1x4x16x128xf32, #tpu.memory_space<vmem>>, %arg8: memref<1x1x16x128xf32, #tpu.memory_space<vmem>>) attributes {dimension_semantics = [#tpu.dimension_semantics<parallel>, #tpu.dimension_semantics<parallel>], iteration_bounds = array<i64: 2, 1>, scalar_prefetch = 0 : i64, scratch_operands = 0 : i64, tpu.core_type = #tpu.core_type<tc>, window_params = [{transform_indices = @transform_0, window_bounds = array<i64: 1, 4, 16, 128>}, {transform_indices = @transform_1, window_bounds = array<i64: 1, 2, 16, 128>}, {transform_indices = @transform_2, window_bounds = array<i64: 4, 2>}, {transform_indices = @transform_3, window_bounds = array<i64: 2>}, {transform_indices = @transform_4, window_bounds = array<i64: 1>}, {transform_indices = @transform_5, window_bounds = array<i64: 1, 4, 16, 128>}, {transform_indices = @transform_6, window_bounds = array<i64: 1, 1, 16, 128>}]} {
    %c0 = arith.constant 0 : index
    %c0_0 = arith.constant 0 : index
    %0 = memref.load %arg4[%c0, %c0_0] : memref<4x2xf32, #tpu.memory_space<smem>>
    %c0_1 = arith.constant 0 : index
    %c1 = arith.constant 1 : index
    %1 = memref.load %arg4[%c0_1, %c1] : memref<4x2xf32, #tpu.memory_space<smem>>
    %c1_2 = arith.constant 1 : index
    %c0_3 = arith.constant 0 : index
    %2 = memref.load %arg4[%c1_2, %c0_3] : memref<4x2xf32, #tpu.memory_space<smem>>
    %c1_4 = arith.constant 1 : index
    %c1_5 = arith.constant 1 : index
    %3 = memref.load %arg4[%c1_4, %c1_5] : memref<4x2xf32, #tpu.memory_space<smem>>
    %c2 = arith.constant 2 : index
    %c0_6 = arith.constant 0 : index
    %4 = memref.load %arg4[%c2, %c0_6] : memref<4x2xf32, #tpu.memory_space<smem>>
    %c2_7 = arith.constant 2 : index
    %c1_8 = arith.constant 1 : index
    %5 = memref.load %arg4[%c2_7, %c1_8] : memref<4x2xf32, #tpu.memory_space<smem>>
    %c3 = arith.constant 3 : index
    %c0_9 = arith.constant 0 : index
    %6 = memref.load %arg4[%c3, %c0_9] : memref<4x2xf32, #tpu.memory_space<smem>>
    %c3_10 = arith.constant 3 : index
    %c1_11 = arith.constant 1 : index
    %7 = memref.load %arg4[%c3_10, %c1_11] : memref<4x2xf32, #tpu.memory_space<smem>>
    %c0_12 = arith.constant 0 : index
    %8 = memref.load %arg5[%c0_12] : memref<2xf32, #tpu.memory_space<smem>>
    %c1_13 = arith.constant 1 : index
    %9 = memref.load %arg5[%c1_13] : memref<2xf32, #tpu.memory_space<smem>>
    %c0_14 = arith.constant 0 : index
    %10 = memref.load %arg6[%c0_14] : memref<1xf32, #tpu.memory_space<smem>>
    %c0_i32 = arith.constant 0 : i32
    %c1_i32 = arith.constant 1 : i32
    %11 = arith.muli %c0_i32, %c1_i32 : i32
    %c0_i32_15 = arith.constant 0 : i32
    %12 = arith.addi %c0_i32_15, %11 : i32
    %c16_i32 = arith.constant 16 : i32
    %13 = arith.muli %12, %c16_i32 : i32
    %14 = tpu.assume_multiple %13, 16 : i32
    %c0_16 = arith.constant 0 : index
    %c0_17 = arith.constant 0 : index
    %15 = arith.index_cast %14 : i32 to index
    %c0_18 = arith.constant 0 : index
    %16 = vector.load %arg2[%c0_16, %c0_17, %15, %c0_18] : memref<1x4x16x128xf32, #tpu.memory_space<vmem>>, vector<1x1x16x128xf32>
    %17 = vector.shape_cast %16 : vector<1x1x16x128xf32> to vector<16x128xf32>
    %c0_19 = arith.constant 0 : index
    %c1_20 = arith.constant 1 : index
    %18 = arith.index_cast %14 : i32 to index
    %c0_21 = arith.constant 0 : index
    %19 = vector.load %arg2[%c0_19, %c1_20, %18, %c0_21] : memref<1x4x16x128xf32, #tpu.memory_space<vmem>>, vector<1x1x16x128xf32>
    %20 = vector.shape_cast %19 : vector<1x1x16x128xf32> to vector<16x128xf32>
    %c0_22 = arith.constant 0 : index
    %c2_23 = arith.constant 2 : index
    %21 = arith.index_cast %14 : i32 to index
    %c0_24 = arith.constant 0 : index
    %22 = vector.load %arg2[%c0_22, %c2_23, %21, %c0_24] : memref<1x4x16x128xf32, #tpu.memory_space<vmem>>, vector<1x1x16x128xf32>
    %23 = vector.shape_cast %22 : vector<1x1x16x128xf32> to vector<16x128xf32>
    %c0_25 = arith.constant 0 : index
    %c3_26 = arith.constant 3 : index
    %24 = arith.index_cast %14 : i32 to index
    %c0_27 = arith.constant 0 : index
    %25 = vector.load %arg2[%c0_25, %c3_26, %24, %c0_27] : memref<1x4x16x128xf32, #tpu.memory_space<vmem>>, vector<1x1x16x128xf32>
    %26 = vector.shape_cast %25 : vector<1x1x16x128xf32> to vector<16x128xf32>
    %c0_28 = arith.constant 0 : index
    %c0_29 = arith.constant 0 : index
    %27 = arith.index_cast %14 : i32 to index
    %c0_30 = arith.constant 0 : index
    %28 = vector.load %arg3[%c0_28, %c0_29, %27, %c0_30] : memref<1x2x16x128xf32, #tpu.memory_space<vmem>>, vector<1x1x16x128xf32>
    %29 = vector.shape_cast %28 : vector<1x1x16x128xf32> to vector<16x128xf32>
    %30 = vector.broadcast %0 : f32 to vector<16x128xf32>
    %31 = arith.mulf %30, %17 : vector<16x128xf32>
    %32 = arith.addf %29, %31 : vector<16x128xf32>
    %33 = vector.broadcast %2 : f32 to vector<16x128xf32>
    %34 = arith.mulf %33, %20 : vector<16x128xf32>
    %35 = arith.addf %32, %34 : vector<16x128xf32>
    %36 = vector.broadcast %4 : f32 to vector<16x128xf32>
    %37 = arith.mulf %36, %23 : vector<16x128xf32>
    %38 = arith.addf %35, %37 : vector<16x128xf32>
    %39 = vector.broadcast %6 : f32 to vector<16x128xf32>
    %40 = arith.mulf %39, %26 : vector<16x128xf32>
    %41 = arith.addf %38, %40 : vector<16x128xf32>
    %cst = arith.constant 0.000000e+00 : f32
    %42 = vector.broadcast %cst : f32 to vector<16x128xf32>
    %43 = arith.maximumf %41, %42 : vector<16x128xf32>
    %44 = vector.broadcast %8 : f32 to vector<16x128xf32>
    %45 = arith.mulf %44, %43 : vector<16x128xf32>
    %c0_31 = arith.constant 0 : index
    %c1_32 = arith.constant 1 : index
    %46 = arith.index_cast %14 : i32 to index
    %c0_33 = arith.constant 0 : index
    %47 = vector.load %arg3[%c0_31, %c1_32, %46, %c0_33] : memref<1x2x16x128xf32, #tpu.memory_space<vmem>>, vector<1x1x16x128xf32>
    %48 = vector.shape_cast %47 : vector<1x1x16x128xf32> to vector<16x128xf32>
    %49 = vector.broadcast %1 : f32 to vector<16x128xf32>
    %50 = arith.mulf %49, %17 : vector<16x128xf32>
    %51 = arith.addf %48, %50 : vector<16x128xf32>
    %52 = vector.broadcast %3 : f32 to vector<16x128xf32>
    %53 = arith.mulf %52, %20 : vector<16x128xf32>
    %54 = arith.addf %51, %53 : vector<16x128xf32>
    %55 = vector.broadcast %5 : f32 to vector<16x128xf32>
    %56 = arith.mulf %55, %23 : vector<16x128xf32>
    %57 = arith.addf %54, %56 : vector<16x128xf32>
    %58 = vector.broadcast %7 : f32 to vector<16x128xf32>
    %59 = arith.mulf %58, %26 : vector<16x128xf32>
    %60 = arith.addf %57, %59 : vector<16x128xf32>
    %cst_34 = arith.constant 0.000000e+00 : f32
    %61 = vector.broadcast %cst_34 : f32 to vector<16x128xf32>
    %62 = arith.maximumf %60, %61 : vector<16x128xf32>
    %63 = vector.broadcast %9 : f32 to vector<16x128xf32>
    %64 = arith.mulf %63, %62 : vector<16x128xf32>
    %65 = arith.addf %45, %64 : vector<16x128xf32>
    %66 = vector.broadcast %10 : f32 to vector<16x128xf32>
    %67 = arith.addf %65, %66 : vector<16x128xf32>
    %68 = arith.negf %67 : vector<16x128xf32>
    %69 = math.exp %68 : vector<16x128xf32>
    %cst_35 = arith.constant 1.000000e+00 : f32
    %70 = vector.broadcast %cst_35 : f32 to vector<16x128xf32>
    %71 = arith.addf %70, %69 : vector<16x128xf32>
    %72 = arith.divf %70, %71 : vector<16x128xf32>
    %c0_36 = arith.constant 0 : index
    %c0_37 = arith.constant 0 : index
    %73 = arith.index_cast %14 : i32 to index
    %c0_38 = arith.constant 0 : index
    %74 = vector.load %arg8[%c0_36, %c0_37, %73, %c0_38] : memref<1x1x16x128xf32, #tpu.memory_space<vmem>>, vector<1x1x16x128xf32>
    %75 = vector.shape_cast %74 : vector<1x1x16x128xf32> to vector<16x128xf32>
    %76 = vector.shape_cast %72 : vector<16x128xf32> to vector<1x1x16x128xf32>
    tpu.vector_store %arg8[%c0_36, %c0_37, %73, %c0_38], %76 {strides = array<i32>} : memref<1x1x16x128xf32, #tpu.memory_space<vmem>>, vector<1x1x16x128xf32>,
    %77 = arith.mulf %72, %17 : vector<16x128xf32>
    %c0_39 = arith.constant 0 : index
    %c0_40 = arith.constant 0 : index
    %78 = arith.index_cast %14 : i32 to index
    %c0_41 = arith.constant 0 : index
    %79 = vector.load %arg7[%c0_39, %c0_40, %78, %c0_41] : memref<1x4x16x128xf32, #tpu.memory_space<vmem>>, vector<1x1x16x128xf32>
    %80 = vector.shape_cast %79 : vector<1x1x16x128xf32> to vector<16x128xf32>
    %81 = vector.shape_cast %77 : vector<16x128xf32> to vector<1x1x16x128xf32>
    tpu.vector_store %arg7[%c0_39, %c0_40, %78, %c0_41], %81 {strides = array<i32>} : memref<1x4x16x128xf32, #tpu.memory_space<vmem>>, vector<1x1x16x128xf32>,
    %82 = arith.mulf %72, %20 : vector<16x128xf32>
    %c0_42 = arith.constant 0 : index
    %c1_43 = arith.constant 1 : index
    %83 = arith.index_cast %14 : i32 to index
    %c0_44 = arith.constant 0 : index
    %84 = vector.load %arg7[%c0_42, %c1_43, %83, %c0_44] : memref<1x4x16x128xf32, #tpu.memory_space<vmem>>, vector<1x1x16x128xf32>
    %85 = vector.shape_cast %84 : vector<1x1x16x128xf32> to vector<16x128xf32>
    %86 = vector.shape_cast %82 : vector<16x128xf32> to vector<1x1x16x128xf32>
    tpu.vector_store %arg7[%c0_42, %c1_43, %83, %c0_44], %86 {strides = array<i32>} : memref<1x4x16x128xf32, #tpu.memory_space<vmem>>, vector<1x1x16x128xf32>,
    %87 = arith.mulf %72, %23 : vector<16x128xf32>
    %c0_45 = arith.constant 0 : index
    %c2_46 = arith.constant 2 : index
    %88 = arith.index_cast %14 : i32 to index
    %c0_47 = arith.constant 0 : index
    %89 = vector.load %arg7[%c0_45, %c2_46, %88, %c0_47] : memref<1x4x16x128xf32, #tpu.memory_space<vmem>>, vector<1x1x16x128xf32>
    %90 = vector.shape_cast %89 : vector<1x1x16x128xf32> to vector<16x128xf32>
    %91 = vector.shape_cast %87 : vector<16x128xf32> to vector<1x1x16x128xf32>
    tpu.vector_store %arg7[%c0_45, %c2_46, %88, %c0_47], %91 {strides = array<i32>} : memref<1x4x16x128xf32, #tpu.memory_space<vmem>>, vector<1x1x16x128xf32>,
    %92 = arith.mulf %72, %26 : vector<16x128xf32>
    %c0_48 = arith.constant 0 : index
    %c3_49 = arith.constant 3 : index
    %93 = arith.index_cast %14 : i32 to index
    %c0_50 = arith.constant 0 : index
    %94 = vector.load %arg7[%c0_48, %c3_49, %93, %c0_50] : memref<1x4x16x128xf32, #tpu.memory_space<vmem>>, vector<1x1x16x128xf32>
    %95 = vector.shape_cast %94 : vector<1x1x16x128xf32> to vector<16x128xf32>
    %96 = vector.shape_cast %92 : vector<16x128xf32> to vector<1x1x16x128xf32>
    tpu.vector_store %arg7[%c0_48, %c3_49, %93, %c0_50], %96 {strides = array<i32>} : memref<1x4x16x128xf32, #tpu.memory_space<vmem>>, vector<1x1x16x128xf32>,
    %c1_i32_51 = arith.constant 1 : i32
    return
  }
  func.func @transform_0(%arg0: i32, %arg1: i32) -> (i32, i32, i32, i32) {
    %c0_i32 = arith.constant 0 : i32
    %c0_i32_0 = arith.constant 0 : i32
    %c0_i32_1 = arith.constant 0 : i32
    return %arg0, %c0_i32, %arg1, %c0_i32_0 : i32, i32, i32, i32
  }
  func.func @transform_1(%arg0: i32, %arg1: i32) -> (i32, i32, i32, i32) {
    %c0_i32 = arith.constant 0 : i32
    %c0_i32_0 = arith.constant 0 : i32
    %c0_i32_1 = arith.constant 0 : i32
    return %arg0, %c0_i32, %arg1, %c0_i32_0 : i32, i32, i32, i32
  }
  func.func @transform_2(%arg0: i32, %arg1: i32) -> (i32, i32) {
    %c0_i32 = arith.constant 0 : i32
    %c0_i32_0 = arith.constant 0 : i32
    %c0_i32_1 = arith.constant 0 : i32
    return %c0_i32, %c0_i32_0 : i32, i32
  }
  func.func @transform_3(%arg0: i32, %arg1: i32) -> i32 {
    %c0_i32 = arith.constant 0 : i32
    %c0_i32_0 = arith.constant 0 : i32
    return %c0_i32 : i32
  }
  func.func @transform_4(%arg0: i32, %arg1: i32) -> i32 {
    %c0_i32 = arith.constant 0 : i32
    %c0_i32_0 = arith.constant 0 : i32
    return %c0_i32 : i32
  }
  func.func @transform_5(%arg0: i32, %arg1: i32) -> (i32, i32, i32, i32) {
    %c0_i32 = arith.constant 0 : i32
    %c0_i32_0 = arith.constant 0 : i32
    %c0_i32_1 = arith.constant 0 : i32
    return %arg0, %c0_i32, %arg1, %c0_i32_0 : i32, i32, i32, i32
  }
  func.func @transform_6(%arg0: i32, %arg1: i32) -> (i32, i32, i32, i32) {
    %c0_i32 = arith.constant 0 : i32
    %c0_i32_0 = arith.constant 0 : i32
    %c0_i32_1 = arith.constant 0 : i32
    return %arg0, %c0_i32, %arg1, %c0_i32_0 : i32, i32, i32, i32
  }
}

</mosaic_0001>

<bundles_post_ra>
// kernel: tpu_custom_call.1
= control target key start
LH: loop header
LB: loop body
LE: loop exit
PB: predicated region body
PF: predicated region fallthrough
CT: control target
= control target key end

     0   :  { %s1539_s0 = inlined_call_operand.hbm [shape: f32[2,4,16,128], index: 0, kind: input, shape index: {}]   ;;  %s1540_s1 = inlined_call_operand.hbm [shape: f32[2,2,16,128], index: 1, kind: input, shape index: {}]   ;;  %s1541_s2 = inlined_call_operand.vmem [shape: f32[4,2], index: 2, kind: input, shape index: {}]   ;;  %s1542_s3 = inlined_call_operand.vmem [shape: f32[2], index: 3, kind: input, shape index: {}]   ;;  %s1543_s4 = inlined_call_operand.<no memory space> [shape: f32[1], index: 4, kind: input, shape index: {}]   ;;  %s1544_s5 = inlined_call_operand.hbm [shape: f32[2,4,16,128], index: 5, kind: output, shape index: {0}]   ;;  %s1545_s6 = inlined_call_operand.hbm [shape: f32[2,1,16,128], index: 6, kind: output, shape index: {1}]  }
   0x1   :  { %1553 = sst [smem:[#allocation22_spill]] %s1539_s0 }
   0x2   :  { %1554 = sst [smem:[#allocation23_spill]] %s1541_s2 }
   0x3   :  { %1555 = sst [smem:[#allocation24_spill]] %s1542_s3 }
   0x4   :  { %12 = sst [smem:[#allocation2]] %s1543_s4 }
   0x5   :  { %13 = vsyncpa [#allocation4], 0 }
   0x6   :  { %15 = vsyncpa [#allocation4 + $0x1], 0 }
   0x7   :  { %16 = vsyncpa [#allocation8], 0 }
   0x8   :  { %18 = vsyncpa [#allocation8 + $0x1], 0 }
   0x9   :  { %19 = vsyncpa [#allocation6], 0 }
   0xa   :  { %20 = vsyncpa [#allocation11], 0 }
   0xb   :  { %21 = vsyncpa [#allocation5], 0 }
   0xc   :  { %23 = vsyncpa [#allocation5 + $0x1], 0 }
   0xd   :  { %24 = vsyncpa [#allocation14], 0 }
   0xe   :  { %26 = vsyncpa [#allocation14 + $0x1], 0  ;;  %s1137_s23 = smov 0   ;;  %s1139_s24 = smov 0  }
   0xf   :  { %s1141_s25 = smov 0   ;;  %s1143_s26 = smov 0  }
  0x10   :  { %s1145_s27 = smov 0   ;;  %s1147_s4 = smov 0  }
  0x11 LB: > { %s711_s28 = sadd.s32 4294967295, %s1087_s4   ;;  %s712_s29 = sadd.s32 4294967294, %s1087_s4   ;;  %s1087_s4 = sphi %s1147_s4, %s32_s4   ;;  %s1083_s27 = sphi %s1145_s27, %s1580_s27   ;;  %s1079_s26 = sphi %s1143_s26, %s1579_s26   ;;  %s1075_s25 = sphi %s1141_s25, %s1578_s25   ;;  %s1071_s24 = sphi %s1139_s24, %s1577_s24   ;;  %s1067_s23 = sphi %s1137_s23, %s1576_s23  }
  0x12   : > { %s53_s30 = sadd.s32 1, %s1075_s25  ;;  %p60_p0 = scmp.ne.s32.totalorder %s1075_s25, %s1071_s24 }
  0x13   : > { %p61_p1 = scmp.eq.s32.totalorder %s1087_s4, 0  ;;  %p66_p2 = scmp.ne.s32.totalorder %s1071_s24, %s1067_s23 }
  0x14   : > { %p1175_p3 = scmp.eq.s32.totalorder %s711_s28, 0  ;;  %p183_p4 = scmp.eq.s32.totalorder %s711_s28, 1 }
  0x15   : > { %p1179_p5 = por %p61_p1, %p60_p0  ;;  %p189_p6 = scmp.eq.s32.totalorder %s712_s29, 1 }
  0x16   : > { %s1556_s7 = scalar_select %p1175_p3, 1, 0 }
  0x17   : > { %p1185_p7 = por %p1175_p3, %p66_p2  ;;  %p1189_p8 = por %p183_p4, %p60_p0 }
  0x18   : > { %p1193_p9 = por %p189_p6, %p66_p2  ;;  %p713_p10 = scmp.ge.s32.totalorder %s1087_s4, 1 }
  0x19   : > { %s1558_s9 = scalar_select %p1185_p7, 1, 0 }
  0x1a   : > { %s1559_s10 = scalar_select %p1189_p8, 1, 0 }
  0x1b   : > { %s1560_s11 = scalar_select %p1193_p9, 1, 0 }
  0x1c   : > { %p224_p11 = scmp.lt.s32.totalorder %s1087_s4, 3  ;;  %s1561_s2 = sld [smem:[#allocation23_spill]] }
  0x1d   : > { %p805_p0 = scmp.lt.s32.totalorder %s1087_s4, 2  ;;  %s1563_s3 = sld [smem:[#allocation24_spill]] }
  0x1e   : > { %p1202_p12 = pnand %p713_p10, %p224_p11 }
  0x1f   : > { %p1215_p2 = pnand %p805_p0, %p1179_p5 }
  0x20   : > { %s1562_s15 = scalar_select %p1202_p12, 1, 0 }
  0x21   : > { %p782_p1 = pneg %p1202_p12 }
  0x22   : > { %s237_s14 = sshll.u32 %s1561_s2, 4  ;;  %s238_s14 = int_to_ptr.vmem [resolvable:$true] %s237_s14 }
  0x23   : > { %s248_s18 = sshll.u32 %s1563_s3, 4  ;;  %p1221_p4 = pnand %p782_p1, %p1175_p3  ;;  %s249_s18 = int_to_ptr.vmem [resolvable:$true] %s248_s18 }
  0x24   : > { %s1564_s19 = scalar_select %p1215_p2, 1, 0 }
  0x25   : > { %s871_s21 = scalar_lea.vmem %s238_s14, 64  ;;  %p873_p10 = pneg %p1221_p4 }
  0x26   : > { %p872_p6 = scmp.ne.s32.totalorder %s238_s14, %s871_s21  ;;  %p879_p9 = scmp.lt.s32.totalorder %s238_s14, %s238_s14 }
  0x27   : > { %p880_p8 = scmp.lt.s32.totalorder %s871_s21, %s871_s21 }
  0x28   : > { %p874_p11 = pnand %p873_p10, %p872_p6 }
  0x29   : > { %p881_p7 = por %p880_p8, %p879_p9 }
  0x2a   : > { %p875_p13 = pneg %p874_p11 }
  0x2c   : > { %p882_p5 = pnand %p881_p7, %p875_p13 }
  0x2e   : > { %885 = shalt.err (!%p882_p5)
}
  0x2f   : > { %s1089_s22 = smov [#allocation9]   ;;  %s886_s28 = scalar_lea.vmem %s249_s18, 16 }
  0x30   : > { %785 = dma.vmem_to_smem (!%p1221_p4), %s238_s14, 64, %s1089_s22, [#allocation6]  }
  0x31   : > { %p887_p0 = scmp.ne.s32.totalorder %s249_s18, %s886_s28  ;;  %p894_p12 = scmp.lt.s32.totalorder %s249_s18, %s249_s18 }
  0x32   : > { %p895_p2 = scmp.lt.s32.totalorder %s886_s28, %s886_s28 }
  0x33   : > { %p889_p1 = pnand %p887_p0, %p873_p10 }
  0x34   : > { %p896_p6 = por %p895_p2, %p894_p12 }
  0x35   : > { %p890_p3 = pneg %p889_p1 }
  0x37   : > { %p897_p11 = pnand %p896_p6, %p890_p3 }
  0x39   : > { %900 = shalt.err (!%p897_p11)
}
  0x3a   : > { %s1090_s29 = smov [#allocation10]   ;;  %s44_s8 = sadd.s32 1, %s1083_s27 }
  0x3b   : > { %788 = dma.vmem_to_smem (!%p1221_p4), %s249_s18, 16, %s1090_s29, [#allocation11]  }
  0x3c   : > { %s1233_s12 = sand.u32 1, %s1075_s25   ;;  %p46_p7 = scmp.ge.s32.totalorder %s44_s8, 2 }
  0x3d   : > { %s717_s13 = sshll.u32 %s1233_s12, 6  ;;  %s762_s14 = sshll.u32 %s1083_s27, 10 }
  0x3e   : > { %s1582_s8 = smov (%p46_p7, %s44_s8), 0  ;;  %s1567_s0 = sld [smem:[#allocation22_spill]] }
  0x3f   : > { %1566 = sst [smem:[#allocation21_spill]] %s1582_s8  ;;  %s48_s18 = ssub.s32 %s1083_s27, %s1582_s8 }
  0x40   : > { %s266_s21 = scalar_lea.vmem [#allocation3], %s717_s13  ;;  %p51_p3 = scmp.eq.s32.totalorder %s48_s18, 0 }
  0x41   : > { %s275_s22 = sshll.u32 %s266_s21, 4  ;;  %s263_s29 = scalar_lea.sflag [#allocation4], %s1233_s12  ;;  %s1246_s22 = int_to_ptr.vmem [resolvable:$true] %s275_s22 }
  0x42   : > { %s1251_s28 = scalar_select %p51_p3, %s1075_s25, %s53_s30  }
  0x43   : > { %p1568_p9 = scmp.ne.s32.totalorder %s1564_s19, 0 }
  0x44   : > { %s1242_s20 = scalar_lea.hbm %s1567_s0, %s762_s14  ;;  %s906_s13 = scalar_lea.hbm %s1567_s0, 2048 }
  0x45   : > { %s901_s2 = scalar_lea.hbm %s1242_s20, 1024  ;;  %p903_p12 = pneg %p1568_p9 }
  0x46   : > { %p902_p8 = scmp.ne.s32.totalorder %s1242_s20, %s901_s2  ;;  %p907_p4 = scmp.lt.u32.totalorder %s1242_s20, %s1567_s0 }
  0x47   : > { %p908_p10 = scmp.lt.u32.totalorder %s906_s13, %s901_s2  ;;  %p910_p0 = scmp.lt.u32.totalorder %s901_s2, %s1242_s20 }
  0x48   : > { %p904_p13 = pnand %p903_p12, %p902_p8 }
  0x49   : > { %p909_p5 = por %p908_p10, %p907_p4 }
  0x4a   : > { %p905_p2 = pneg %p904_p13 }
  0x4b   : > { %p911_p1 = por %p910_p0, %p909_p5 }
  0x4d   : > { %p912_p6 = pnand %p911_p1, %p905_p2 }
  0x4f   : > { %915 = shalt.err (!%p912_p6)
}
  0x50   : > { %s916_s30 = scalar_lea.vmem %s1246_s22, 1024  ;;  %s1091_s21 = smov [#allocation3]  }
  0x51   : > { %p917_p11 = scmp.ne.s32.totalorder %s1246_s22, %s916_s30  ;;  %s921_s14 = sshll.u32 %s1091_s21, 4  ;;  %s922_s14 = int_to_ptr.vmem [resolvable:$false] %s921_s14 }
  0x52   : > { %s923_s16 = scalar_lea.vmem %s922_s14, 2048  ;;  %p924_p8 = scmp.lt.s32.totalorder %s1246_s22, %s922_s14 }
  0x53   : > { %p919_p7 = pnand %p917_p11, %p903_p12  ;;  %p925_p13 = scmp.lt.s32.totalorder %s923_s16, %s916_s30 }
  0x55   : > { %p920_p3 = pneg %p919_p7  ;;  %p926_p4 = por %p925_p13, %p924_p8 }
  0x57   : > { %p927_p10 = pnand %p926_p4, %p920_p3 }
  0x59   : > { %930 = shalt.err (!%p927_p10)
}
  0x5a   : > { %s1092_s2 = smov 128   ;;  %s1093_s13 = smov 8  }
  0x5b   : > { %792 = dma.hbm_to_vmem [thread:$0]  (!%p1568_p9), %s1242_s20, 1024, %s1246_s22, %s263_s29, %s1092_s2, %s1092_s2, %s1093_s13  }
  0x5c   : > { %s720_s17 = sshll.u32 %s1233_s12, 5  ;;  %s763_s18 = sshll.u32 %s1083_s27, 9 }
  0x5d   : > { %s1289_s14 = scalar_lea.hbm %s1540_s1, %s763_s18  ;;  %s289_s16 = scalar_lea.vmem [#allocation7], %s720_s17 }
  0x5e   : > { %s298_s0 = sshll.u32 %s289_s16, 4  ;;  %s286_s3 = scalar_lea.sflag [#allocation8], %s1233_s12  ;;  %s1291_s0 = int_to_ptr.vmem [resolvable:$true] %s298_s0 }
  0x5f   : > { %s931_s8 = scalar_lea.hbm %s1289_s14, 512  ;;  %s936_s29 = scalar_lea.hbm %s1540_s1, 1024 }
  0x60   : > { %p932_p2 = scmp.ne.s32.totalorder %s1289_s14, %s931_s8  ;;  %p937_p1 = scmp.lt.u32.totalorder %s1289_s14, %s1540_s1 }
  0x61   : > { %p938_p6 = scmp.lt.u32.totalorder %s936_s29, %s931_s8  ;;  %p940_p7 = scmp.lt.u32.totalorder %s931_s8, %s1289_s14 }
  0x62   : > { %p934_p5 = pnand %p932_p2, %p903_p12 }
  0x63   : > { %p939_p11 = por %p938_p6, %p937_p1 }
  0x64   : > { %p935_p0 = pneg %p934_p5 }
  0x65   : > { %p941_p3 = por %p940_p7, %p939_p11 }
  0x67   : > { %p942_p8 = pnand %p941_p3, %p935_p0 }
  0x69   : > { %945 = shalt.err (!%p942_p8)
}
  0x6a   : > { %s946_s17 = scalar_lea.vmem %s1291_s0, 512  ;;  %s1094_s21 = smov [#allocation7]  }
  0x6b   : > { %p947_p13 = scmp.ne.s32.totalorder %s1291_s0, %s946_s17  ;;  %s951_s16 = sshll.u32 %s1094_s21, 4  ;;  %s952_s16 = int_to_ptr.vmem [resolvable:$false] %s951_s16 }
  0x6c   : > { %s953_s20 = scalar_lea.vmem %s952_s16, 1024  ;;  %p954_p2 = scmp.lt.s32.totalorder %s1291_s0, %s952_s16 }
  0x6d   : > { %p949_p4 = pnand %p947_p13, %p903_p12  ;;  %p955_p5 = scmp.lt.s32.totalorder %s953_s20, %s946_s17 }
  0x6f   : > { %p950_p10 = pneg %p949_p4  ;;  %p956_p1 = por %p955_p5, %p954_p2 }
  0x71   : > { %p957_p6 = pnand %p956_p1, %p950_p10 }
  0x73   : > { %960 = shalt.err (!%p957_p6)
}
  0x74   : > { %795 = dma.hbm_to_vmem [thread:$0]  (!%p1568_p9), %s1289_s14, 512, %s1291_s0, %s286_s3, %s1092_s2, %s1092_s2, %s1093_s13  }
  0x75   : > { %p1569_p12 = scmp.ne.s32.totalorder %s1562_s15, 0 }
  0x76   : > { %s1325_s8 = sand.u32 (!%p1569_p12), 1, %s1071_s24   ;;  %p1570_p0 = scmp.ne.s32.totalorder (!%p1569_p12), %s1558_s9, 0 }
  0x77   : > { %310 = sbr.rel (%p1569_p12) target bundleno = 231 (0xe7), region = 40  ;;  %s724_s22 = sshll.u32 (!%p1569_p12), %s1325_s8, 6 }
  0x78   : > { %s313_s19 = scalar_lea.sflag (!%p1569_p12), [#allocation4], %s1325_s8  ;;  %s1331_s29 = scalar_lea.vmem (!%p1569_p12), [#allocation3], %s724_s22 }
  0x7e   : > { %1042 = dma.done.wait (%p1570_p0), %s313_s19, 1024  }
  0x7f   : > { %1044 = vsyncadd (%p1570_p0), %s313_s19, 4294966272  ;;  %s725_s0 = sshll.u32 %s1325_s8, 5  ;;  %s322_s3 = scalar_lea.sflag [#allocation8], %s1325_s8 }
  0x80   : > { %s1339_s15 = scalar_lea.vmem [#allocation7], %s725_s0 }
  0x81   : > { %1046 = dma.done.wait (%p1570_p0), %s322_s3, 512  }
  0x82   : > { %1048 = vsyncadd (%p1570_p0), %s322_s3, 4294966784  ;;  %p1571_p9 = scmp.ne.s32.totalorder %s1556_s7, 0 }
  0x84   : > { %1050 = dma.done.wait (%p1571_p9), [#allocation6], 64  }
  0x85   : > { %1052 = vsyncadd (%p1571_p9), [#allocation6], 4294967232 }
  0x86   : > { %1054 = dma.done.wait (%p1571_p9), [#allocation11], 16  }
  0x87   : > { %1056 = vsyncadd (%p1571_p9), [#allocation11], 4294967280 }
  0x88   : > { %338 = sfence }
  0x89   : > { %s377_s12 = sld [smem:[#allocation9]]  ;;  %s730_s9 = sld [smem:[#allocation9 + $0x1]]  ;;  %v1366_v0 = vld [vmem:[%s1331_s29] sm:$0xff]  ;;  %v1369_v1 = vld [vmem:[%s1331_s29 + $0x8] sm:$0xff]  ;;  %v1372_v2 = vld [vmem:[%s1331_s29 + $0x10] sm:$0xff] }
  0x8a   : > { %s1353_s2 = sld [smem:[#allocation9 + $0x80]]  ;;  %s1355_s13 = sld [smem:[#allocation9 + $0x81]]  ;;  %v402_v3 = vld [vmem:[%s1339_s15] sm:$0xff]  ;;  %v744_v7 = vld [vmem:[%s1339_s15 + $0x10] sm:$0xff]  ;;  %v1399_v23 = vld [vmem:[%s1331_s29 + $0x18] sm:$0xff] }
  0x8b   : > { %s1357_s14 = sld [smem:[#allocation9 + $0x100]]  ;;  %s1359_s18 = sld [smem:[#allocation9 + $0x101]]  ;;  %v1376_v5 = vld [vmem:[%s1331_s29 + $0x20] sm:$0xff]  ;;  %v1386_v10 = vld [vmem:[%s1331_s29 + $0x30] sm:$0xff]  ;;  %v403_v24 = vld [vmem:[%s1339_s15 + $0x8] sm:$0xff] }
  0x8c   : > { %s1361_s7 = sld [smem:[#allocation9 + $0x180]]  ;;  %s1363_s30 = sld [smem:[#allocation9 + $0x181]]  ;;  %v1405_v28 = vld [vmem:[%s1331_s29 + $0x28] sm:$0xff]  ;;  %v1408_v29 = vld [vmem:[%s1331_s29 + $0x38] sm:$0xff] }
  0x8d   : > { %s1381_s17 = sld [smem:[#allocation10]]  ;;  %s1383_s21 = sld [smem:[#allocation10 + $0x1]]  ;;  %v745_v30 = vld [vmem:[%s1339_s15 + $0x18] sm:$0xff] }
  0x8e   : > { %s1412_s16 = sld [smem:[#allocation2]]  ;;  %s729_s20 = sshll.u32 %s1325_s8, 4 }
  0x8f   : > { %v404_v4 = vstv %s377_s12  ;;  %v432_v8 = vstv %s730_s9  ;;  %s372_s19 = scalar_lea.vmem [#allocation13], %s729_s20  ;;  %s765_s0 = sshll.u32 %s1079_s26, 8 }
  0x90   : > { %v405_v6 = vmul.f32 %v404_v4, %v1366_v0  ;;  %v406_v9 = vmul.f32 %v404_v4, %v1369_v1  ;;  %v409_v11 = vstv %s1353_s2  ;;  %v433_v12 = vmul.f32 %v432_v8, %v1366_v0  ;;  %s534_s29 = sshll.u32 %s372_s19, 4  ;;  %s1434_s3 = scalar_lea.vmem [#allocation12], %s724_s22  ;;  %s1425_s29 = int_to_ptr.vmem [resolvable:$true] %s534_s29 }
  0x91   : > { %v437_v13 = vstv %s1355_s13  ;;  %v434_v14 = vmul.f32 %v432_v8, %v1369_v1  ;;  %v410_v16 = vmul.f32 %v1372_v2, %v409_v11  ;;  %v414_v17 = vstv %s1357_s14  ;;  %s516_s15 = sshll.u32 %s1434_s3, 4  ;;  %s764_s12 = sshll.u32 %s1079_s26, 10  ;;  %s1447_s15 = int_to_ptr.vmem [resolvable:$true] %s516_s15 }
  0x92   : > { %v407_v15 = vadd.f32 %v405_v6, %v402_v3  ;;  %v438_v18 = vmul.f32 %v1372_v2, %v437_v13  ;;  %v415_v19 = vmul.f32 %v1376_v5, %v414_v17  ;;  %v419_v20 = vstv %s1361_s7  ;;  %s1445_s22 = scalar_lea.hbm %s1545_s6, %s765_s0  ;;  %s1456_s14 = scalar_lea.hbm %s1544_s5, %s764_s12 }
  0x93   : > { %v435_v21 = vadd.f32 %v744_v7, %v433_v12  ;;  %v442_v22 = vstv %s1359_s18  ;;  %v420_v26 = vmul.f32 %v1386_v10, %v419_v20  ;;  %v447_v32 = vstv %s1363_s30  ;;  %s501_s18 = scalar_lea.sflag [#allocation14], %s1325_s8  ;;  %s961_s7 = scalar_lea.vmem %s1425_s29, 256 }
  0x94   : > { %v412_v25 = vadd.f32 %v410_v16, %v407_v15  ;;  %v443_v27 = vmul.f32 %v1376_v5, %v442_v22  ;;  %v448_v34 = vmul.f32 %v1386_v10, %v447_v32  ;;  %v408_v35 = vadd.f32 %v406_v9, %v403_v24  ;;  %p962_p11 = scmp.ne.s32.totalorder %s1425_s29, %s961_s7  ;;  %p1572_p7 = scmp.ne.s32.totalorder %s1559_s10, 0 }
  0x95   : > { %v440_v31 = vadd.f32 %v438_v18, %v435_v21  ;;  %v411_v36 = vmul.f32 %v1399_v23, %v409_v11  ;;  %v416_v38 = vmul.f32 %v1405_v28, %v414_v17  ;;  %v421_v39 = vmul.f32 %v1408_v29, %v419_v20  ;;  %s1095_s30 = smov [#allocation13]  }
  0x96   : > { %v417_v33 = vadd.f32 %v415_v19, %v412_v25  ;;  %v436_v40 = vadd.f32 %v745_v30, %v434_v14  ;;  %v439_v43 = vmul.f32 %v1399_v23, %v437_v13  ;;  %v444_v44 = vmul.f32 %v1405_v28, %v442_v22  ;;  %p963_p3 = pnand %p962_p11, %p1572_p7 }
  0x97   : > { %v445_v37 = vadd.f32 %v443_v27, %v440_v31  ;;  %v413_v42 = vadd.f32 %v411_v36, %v408_v35  ;;  %v426_v45 = vstv %s1381_s17  ;;  %v454_v47 = vstv %s1383_s21  ;;  %s965_s17 = sshll.u32 %s1095_s30, 4  ;;  %s966_s17 = int_to_ptr.vmem [resolvable:$false] %s965_s17 }
  0x98   : > { %v422_v41 = vadd.f32 %v420_v26, %v417_v33  ;;  %v441_v50 = vadd.f32 %v439_v43, %v436_v40  ;;  %v449_v51 = vmul.f32 %v1408_v29, %v447_v32  ;;  %v459_v57 = vstv %s1412_s16  ;;  %p964_p8 = pneg %p963_p3  ;;  %s967_s21 = scalar_lea.vmem %s966_s17, 512 }
  0x99   : > { %v450_v46 = vadd.f32 %v448_v34, %v445_v37  ;;  %v418_v49 = vadd.f32 %v416_v38, %v413_v42  ;;  %p968_p13 = scmp.lt.s32.totalorder %s1425_s29, %s966_s17  ;;  %p969_p4 = scmp.lt.s32.totalorder %s967_s21, %s961_s7 }
  0x9a   : > { %v424_v48 = vmax.f32 %v422_v41, 0.0  ;;  %v446_v55 = vadd.f32 %v444_v44, %v441_v50 }
  0x9b   : > { %v452_v52 = vmax.f32 %v450_v46, 0.0  ;;  %v423_v54 = vadd.f32 %v421_v39, %v418_v49  ;;  %p970_p10 = por %p969_p4, %p968_p13 }
  0x9c   : > { %v427_v53 = vmul.f32 %v426_v45, %v424_v48  ;;  %v451_v59 = vadd.f32 %v449_v51, %v446_v55 }
  0x9d   : > { %v455_v56 = vmul.f32 %v454_v47, %v452_v52  ;;  %v425_v58 = vmax.f32 %v423_v54, 0.0  ;;  %p971_p2 = pnand %p970_p10, %p964_p8 }
  0x9e   : > { %v453_v62 = vmax.f32 %v451_v59, 0.0 }
  0x9f   : > { %v457_v60 = vadd.f32 %v455_v56, %v427_v53  ;;  %v428_v61 = vmul.f32 %v426_v45, %v425_v58 }
  0xa0   : > { %v456_v3 = vmul.f32 %v454_v47, %v453_v62 }
  0xa1   : > { %v460_v63 = vadd.f32 %v459_v57, %v457_v60 }
  0xa2   : > { %v458_v6 = vadd.f32 %v456_v3, %v428_v61 }
  0xa3   : > { %v746_v4 = vmul.f32 -1.442695, %v460_v63 }
  0xa4   : > { %v461_v7 = vadd.f32 %v459_v57, %v458_v6 }
  0xa5   : > { %863 = vpow2.f32 %v746_v4 }
  0xa6   : > { %v747_v8 = vmul.f32 -1.442695, %v461_v7 }
  0xa8   : > { %865 = vpow2.f32 %v747_v8 }
  0xaf   : > { %v864_v9 = vpop.eup %863 }
  0xb0   : > { %v468_v11 = vadd.f32 1.0, %v864_v9 }
  0xb2   : > { %867 = vrcp.f32 %v468_v11  ;;  %v866_v12 = vpop.eup %865 }
  0xb3   : > { %v469_v13 = vadd.f32 1.0, %v866_v12 }
  0xb5   : > { %869 = vrcp.f32 %v469_v13 }
  0xbc   : > { %v868_v14 = vpop.eup %867 }
  0xbd   : > { %474 = vst [vmem:[%s372_s19] sm:$0xff] %v868_v14  ;;  %v476_v15 = vmul.f32 %v868_v14, %v1366_v0  ;;  %v480_v16 = vmul.f32 %v868_v14, %v1372_v2  ;;  %v485_v17 = vmul.f32 %v868_v14, %v1376_v5  ;;  %v490_v18 = vmul.f32 %v868_v14, %v1386_v10 }
  0xbf   : > { %478 = vst [vmem:[%s1434_s3] sm:$0xff] %v476_v15  ;;  %748 = vst [vmem:[%s1434_s3 + $0x10] sm:$0xff] %v480_v16  ;;  %v870_v0 = vpop.eup %869 }
  0xc0   : > { %750 = vst [vmem:[%s1434_s3 + $0x20] sm:$0xff] %v485_v17  ;;  %752 = vst [vmem:[%s1434_s3 + $0x30] sm:$0xff] %v490_v18  ;;  %v477_v2 = vmul.f32 %v870_v0, %v1369_v1  ;;  %v481_v5 = vmul.f32 %v870_v0, %v1399_v23  ;;  %v486_v10 = vmul.f32 %v870_v0, %v1405_v28 }
  0xc1   : > { %475 = vst [vmem:[%s372_s19 + $0x8] sm:$0xff] %v870_v0  ;;  %v491_v19 = vmul.f32 %v870_v0, %v1408_v29 }
  0xc2   : > { %974 = shalt.err (!%p971_p2)
}
  0xc3   : > { %s975_s16 = scalar_lea.hbm %s1445_s22, 256  ;;  %s979_s0 = scalar_lea.hbm %s1545_s6, 512 }
  0xc4   : > { %p976_p5 = scmp.ne.s32.totalorder %s1445_s22, %s975_s16  ;;  %p980_p12 = scmp.lt.u32.totalorder %s1445_s22, %s1545_s6 }
  0xc5   : > { %p981_p0 = scmp.lt.u32.totalorder %s979_s0, %s975_s16  ;;  %p983_p11 = scmp.lt.u32.totalorder %s975_s16, %s1445_s22 }
  0xc6   : > { %p977_p1 = pnand %p976_p5, %p1572_p7 }
  0xc7   : > { %p982_p9 = por %p981_p0, %p980_p12 }
  0xc8   : > { %p978_p6 = pneg %p977_p1 }
  0xc9   : > { %p984_p3 = por %p983_p11, %p982_p9 }
  0xcb   : > { %p985_p8 = pnand %p984_p3, %p978_p6 }
  0xcd   : > { %988 = shalt.err (!%p985_p8)
}
  0xce   : > { %s1096_s2 = smov 128   ;;  %s1097_s26 = smov 8   ;;  %479 = vst [vmem:[%s1434_s3 + $0x8] sm:$0xff] %v477_v2  ;;  %749 = vst [vmem:[%s1434_s3 + $0x18] sm:$0xff] %v481_v5 }
  0xcf   : > { %779 = dma.vmem_to_hbm [thread:$0]  (%p1572_p7), %s1425_s29, 256, %s1445_s22, %s501_s18, %s1096_s2, %s1096_s2, %s1097_s26  }
  0xd0   : > { %751 = vst [vmem:[%s1434_s3 + $0x28] sm:$0xff] %v486_v10  ;;  %753 = vst [vmem:[%s1434_s3 + $0x38] sm:$0xff] %v491_v19  ;;  %s496_s13 = scalar_lea.sflag [#allocation5], %s1325_s8  ;;  %s989_s7 = scalar_lea.vmem %s1447_s15, 1024 }
  0xd1   : > { %p990_p13 = scmp.ne.s32.totalorder %s1447_s15, %s989_s7  ;;  %s1098_s30 = smov [#allocation12]  }
  0xd2   : > { %s993_s17 = sshll.u32 %s1098_s30, 4  ;;  %s994_s17 = int_to_ptr.vmem [resolvable:$false] %s993_s17 }
  0xd3   : > { %p991_p4 = pnand %p990_p13, %p1572_p7  ;;  %s995_s21 = scalar_lea.vmem %s994_s17, 2048 }
  0xd4   : > { %p996_p2 = scmp.lt.s32.totalorder %s1447_s15, %s994_s17  ;;  %p997_p5 = scmp.lt.s32.totalorder %s995_s21, %s989_s7 }
  0xd5   : > { %p992_p10 = pneg %p991_p4 }
  0xd6   : > { %p998_p1 = por %p997_p5, %p996_p2 }
  0xd8   : > { %p999_p6 = pnand %p998_p1, %p992_p10 }
  0xda   : > { %1002 = shalt.err (!%p999_p6)
}
  0xdb   : > { %s1003_s29 = scalar_lea.hbm %s1456_s14, 1024  ;;  %s1007_s18 = scalar_lea.hbm %s1544_s5, 2048 }
  0xdc   : > { %p1004_p12 = scmp.ne.s32.totalorder %s1456_s14, %s1003_s29  ;;  %p1008_p11 = scmp.lt.u32.totalorder %s1456_s14, %s1544_s5 }
  0xdd   : > { %p1009_p3 = scmp.lt.u32.totalorder %s1007_s18, %s1003_s29  ;;  %p1011_p13 = scmp.lt.u32.totalorder %s1003_s29, %s1456_s14 }
  0xde   : > { %p1005_p0 = pnand %p1004_p12, %p1572_p7 }
  0xdf   : > { %p1010_p8 = por %p1009_p3, %p1008_p11 }
  0xe0   : > { %p1006_p9 = pneg %p1005_p0 }
  0xe1   : > { %p1012_p4 = por %p1011_p13, %p1010_p8 }
  0xe3   : > { %p1013_p10 = pnand %p1012_p4, %p1006_p9 }
  0xe5   : > { %1016 = shalt.err (!%p1013_p10)
}
  0xe6   : > { %778 = dma.vmem_to_hbm [thread:$0]  (%p1572_p7), %s1447_s15, 1024, %s1456_s14, %s496_s13, %s1096_s2, %s1096_s2, %s1097_s26  }
  0xe7 PF: > { %s549_s19 = sand.u32 1, %s1067_s23   ;;  %p1573_p2 = scmp.ne.s32.totalorder %s1560_s11, 0 }
  0xe8   : > { %p1574_p5 = scmp.ge.s32.totalorder %s1087_s4, 2  ;;  %s550_s0 = scalar_lea.sflag [#allocation5], %s549_s19 }
  0xea   : > { %p797_p1 = pnand %p1574_p5, %p1573_p2 }
  0xec   : > { %1058 = dma.done.wait (!%p797_p1), %s550_s0, 1024  }
  0xed   : > { %1060 = vsyncadd (!%p797_p1), %s550_s0, 4294966272  ;;  %s559_s10 = scalar_lea.sflag [#allocation14], %s549_s19 }
  0xee   : > { %1062 = dma.done.wait (!%p797_p1), %s559_s10, 256  }
  0xef   : > { %1064 = vsyncadd (!%p797_p1), %s559_s10, 4294967040  ;;  %s32_s4 = sadd.s32 1, %s1087_s4   ;;  %s1575_s8 = sld [smem:[#allocation21_spill]] }
  0xf0   : > { %p29_p6 = scmp.ge.s32.totalorder %s32_s4, 4   ;;  %s1576_s23 = smov %s1071_s24 }
  0xf1   : > { %s1577_s24 = smov %s1075_s25  ;;  %s1578_s25 = smov %s1251_s28 }
  0xf2   : > { %s1579_s26 = smov %s1083_s27  ;;  %31 = sbr.rel (!%p29_p6) target bundleno = 17 (0x11), region = 131 }
  0xf5   : > { %s1580_s27 = smov %s1575_s8 }
  0xf9   :  { %564 = vsyncpa [#allocation4], 1 }
  0xfa   :  { %566 = vsyncpa [#allocation4 + $0x1], 1 }
  0xfb   :  { %567 = vsyncpa [#allocation8], 1 }
  0xfc   :  { %569 = vsyncpa [#allocation8 + $0x1], 1 }
  0xfd   :  { %570 = vsyncpa [#allocation5], 1 }
  0xfe   :  { %572 = vsyncpa [#allocation5 + $0x1], 1 }
  0xff   :  { %573 = vsyncpa [#allocation14], 1 }
 0x100   :  { %575 = vsyncpa [#allocation14 + $0x1], 1 }
 0x101   :  { %576 = vsyncpa [#allocation6], 1 }
 0x102   :  { %578 = vsyncpa [#allocation6 + $0x1], 1 }
 0x103   :  { %579 = vsyncpa [#allocation11], 1 }

</bundles_post_ra>
